<compile_context>
chip_gen: v7x
topology: tpu7x:2x2x1
jax: 0.10.0
libtpu: 0.0.40
codegen_flags: <defaults>
</compile_context>

<pallas_src>
import math

import jax
import jax.numpy as jnp
from jax import lax
from jax.experimental import pallas as pl
from jax.experimental.pallas import tpu as pltpu


def _round_up(x, m):
    return (x + m - 1) // m * m


def _vmem_cap_bytes():
    # Generation-aware scoped-VMEM ceiling: ~96 MiB on v5e/v6e (128 MiB
    # physical VMEM), ~40 MiB on v7x (64 MiB physical VMEM).
    try:
        phys = int(pltpu.get_tpu_info().vmem_capacity_bytes)
    except Exception:
        phys = 64 << 20
    return (96 << 20) if phys >= (128 << 20) else (40 << 20)


# ---------------------------------------------------------------------------
# Kernel 1: fused QKV projection over the flattened (B*S_pad, Dp) activations.
# One (TM, Dp) x (Dp, 3*Dp) matmul per grid step; q/k/v written to separate,
# contiguous output arrays.
# ---------------------------------------------------------------------------
def qkv_proj_kernel(x_ref, w_ref, b_ref, q_ref, k_ref, v_ref):
    dp = q_ref.shape[-1]
    acc = jnp.dot(x_ref[...], w_ref[...], preferred_element_type=jnp.float32)
    acc = acc + b_ref[...]
    q_ref[...] = acc[:, 0 * dp:1 * dp].astype(q_ref.dtype)
    k_ref[...] = acc[:, 1 * dp:2 * dp].astype(k_ref.dtype)
    v_ref[...] = acc[:, 2 * dp:3 * dp].astype(v_ref.dtype)


# ---------------------------------------------------------------------------
# Kernel 2: flash-style attention with online softmax over kv tiles.
# ---------------------------------------------------------------------------
def _make_attention_kernel(tk, s_true, mask_keys, kv_resident):
    def kernel(q_ref, k_ref, v_ref, o_ref, m_sc, l_sc, acc_sc):
        ki = pl.program_id(2)
        nk = pl.num_programs(2)

        @pl.when(ki == 0)
        def _init():
            m_sc[...] = jnp.full_like(m_sc, -jnp.inf)
            l_sc[...] = jnp.zeros_like(l_sc)
            acc_sc[...] = jnp.zeros_like(acc_sc)

        if kv_resident:
            # K/V blocks hold the whole padded sequence (read from HBM once
            # per batch element); slice the current kv chunk in VMEM.
            start = pl.multiple_of(ki * tk, tk)
            k_tile = k_ref[pl.ds(start, tk), :]
            v_tile = v_ref[pl.ds(start, tk), :]
        else:
            k_tile = k_ref[...]
            v_tile = v_ref[...]

        # q already carries the 1/sqrt(d) scale (folded into wq/bq).  Contract
        # the feature dims directly (same pattern as the reference flash
        # kernel) -> no explicit k.T materialization.
        s = lax.dot_general(q_ref[...], k_tile,
                            (((1,), (1,)), ((), ())),
                            preferred_element_type=jnp.float32)   # (TQ, TK) f32

        def _update(scores):
            m_prev = m_sc[...]
            m_new = jnp.maximum(m_prev, jnp.max(scores, axis=-1, keepdims=True))
            alpha = jnp.exp(m_prev - m_new)
            p = jnp.exp(scores - m_new)                           # f32 VPU/EUP
            l_sc[...] = alpha * l_sc[...] + jnp.sum(p, axis=-1, keepdims=True)
            acc_sc[...] = alpha * acc_sc[...] + jnp.dot(
                p.astype(v_tile.dtype), v_tile,
                preferred_element_type=jnp.float32)
            m_sc[...] = m_new

        if mask_keys:
            # Padded keys only exist in the LAST kv tile; interior tiles skip
            # the iota/compare/select entirely.
            @pl.when(ki < nk - 1)
            def _interior():
                _update(s)

            @pl.when(ki == nk - 1)
            def _last():
                kidx = ki * tk + lax.broadcasted_iota(jnp.int32, s.shape, 1)
                _update(jnp.where(kidx < s_true, s, -jnp.inf))
        else:
            _update(s)

        @pl.when(ki == nk - 1)
        def _finalize():
            inv_l = pl.reciprocal(l_sc[...], approx=True)         # EUP slot
            o_ref[...] = (acc_sc[...] * inv_l).astype(o_ref.dtype)

    return kernel


def causal_attention(x, wq, bq, wk, bk, wv, bv):
    """x: (B, S, D); wq/wk/wv: PyTorch-style (D_out, D_in); bq/bk/bv: (D,)."""
    B, S, D = x.shape
    out_dtype = x.dtype
    cap = _vmem_cap_bytes()

    # Lane-dense feature padding; large, 256-aligned sequence tiles.
    Dp = _round_up(D, 128)
    if S <= 256:
        TQ = TK = _round_up(S, 8)
    else:
        TQ = 256
        TK = 512 if S >= 512 else 256
    S_pad = _round_up(S, TK)          # multiple of both TQ and TK
    nq, nk = S_pad // TQ, S_pad // TK
    mask_keys = S_pad != S            # padding < TK, so last tile has real keys
    scale = 1.0 / math.sqrt(D)        # query.size(-1) of the original module

    # Flattened M axis for the projection.
    M = B * S_pad
    if M <= 512:
        TM = M
    elif M % 512 == 0:
        TM = 512
    elif M % 256 == 0:
        TM = 256
    elif M % 128 == 0:
        TM = 128
    else:
        TM = S_pad                    # always divides M, multiple of 8

    # Fused, padded, pre-transposed QKV weight (Dp, 3*Dp) and bias (1, 3*Dp);
    # the softmax scale is folded into the Q weight/bias (parameter prep only).
    w_qkv = jnp.zeros((Dp, 3 * Dp), jnp.float32)
    w_qkv = w_qkv.at[:D, 0:D].set(wq.T * scale)
    w_qkv = w_qkv.at[:D, Dp:Dp + D].set(wk.T)
    w_qkv = w_qkv.at[:D, 2 * Dp:2 * Dp + D].set(wv.T)
    b_qkv = jnp.zeros((1, 3 * Dp), jnp.float32)
    b_qkv = b_qkv.at[0, 0:D].set(bq * scale)
    b_qkv = b_qkv.at[0, Dp:Dp + D].set(bk)
    b_qkv = b_qkv.at[0, 2 * Dp:2 * Dp + D].set(bv)

    x_pad = jnp.pad(x, ((0, 0), (0, S_pad - S), (0, Dp - D)))
    x_flat = x_pad.reshape(M, Dp).astype(jnp.bfloat16)   # bf16 MXU operands
    w_bf = w_qkv.astype(jnp.bfloat16)

    def _vmem_limit(ws):
        return int(min(cap, max(16 << 20, 2 * ws)))

    # ---- kernel 1: fused QKV projection ------------------------------------
    w_bytes = Dp * 3 * Dp * 2
    # Resident weight: single-buffer it when it is big enough to matter
    # (prevents 2x weight VMEM blowing v7x's 64 MiB at large D).
    single_buffer_w = w_bytes > (4 << 20)
    wkw = dict(pipeline_mode=pl.Buffered(1)) if single_buffer_w else {}
    wf = 1 if single_buffer_w else 2
    proj_ws = (2 * TM * Dp * 2                       # x block (double-buffered)
               + wf * (w_bytes + 3 * Dp * 4)         # weight + bias
               + 3 * 2 * TM * Dp * 2                 # q,k,v out blocks
               + TM * 3 * Dp * 4)                    # f32 accumulator

    q_flat, k_flat, v_flat = pl.pallas_call(
        qkv_proj_kernel,
        out_shape=tuple(jax.ShapeDtypeStruct((M, Dp), jnp.bfloat16)
                        for _ in range(3)),
        grid_spec=pltpu.PrefetchScalarGridSpec(
            num_scalar_prefetch=0,
            grid=(M // TM,),
            in_specs=[
                pl.BlockSpec((TM, Dp), lambda i: (i, 0)),
                pl.BlockSpec((Dp, 3 * Dp), lambda i: (0, 0), **wkw),
                pl.BlockSpec((1, 3 * Dp), lambda i: (0, 0), **wkw),
            ],
            out_specs=[pl.BlockSpec((TM, Dp), lambda i: (i, 0))
                       for _ in range(3)],
        ),
        compiler_params=pltpu.CompilerParams(
            dimension_semantics=("parallel",),
            vmem_limit_bytes=_vmem_limit(proj_ws),
        ),
    )(x_flat, w_bf, b_qkv)

    q = q_flat.reshape(B, S_pad, Dp)
    k = k_flat.reshape(B, S_pad, Dp)
    v = v_flat.reshape(B, S_pad, Dp)

    # ---- kernel 2: flash attention ------------------------------------------
    # Keep K+V fully VMEM-resident per batch element when they fit comfortably
    # (removes the nq-fold K/V re-read from HBM); otherwise stream (TK, Dp)
    # tiles per kv step.
    kv_buf_bytes = 2 * 2 * S_pad * Dp * 2            # K+V, double-buffered, bf16
    kv_resident = (S_pad > TK) and (kv_buf_bytes <= min(16 << 20, cap // 3))

    def _kv_spec():
        if kv_resident:
            return pl.BlockSpec((pl.Squeezed(), S_pad, Dp),
                                lambda b, qi, ki: (b, 0, 0))
        return pl.BlockSpec((pl.Squeezed(), TK, Dp),
                            lambda b, qi, ki: (b, ki, 0))

    kv_block = S_pad if kv_resident else TK
    attn_ws = (2 * TQ * Dp * 2                       # q (double-buffered)
               + 2 * 2 * kv_block * Dp * 2           # k + v
               + 2 * TQ * Dp * jnp.dtype(out_dtype).itemsize   # out
               + TQ * Dp * 4 + 2 * TQ * 4            # scratch acc / m / l
               + 2 * TQ * TK * 4)                    # f32 score/p intermediates

    attn_kernel = _make_attention_kernel(TK, S, mask_keys, kv_resident)
    out_pad = pl.pallas_call(
        attn_kernel,
        out_shape=jax.ShapeDtypeStruct((B, S_pad, Dp), out_dtype),
        grid_spec=pltpu.PrefetchScalarGridSpec(
            num_scalar_prefetch=0,
            grid=(B, nq, nk),
            in_specs=[
                pl.BlockSpec((pl.Squeezed(), TQ, Dp),
                             lambda b, qi, ki: (b, qi, 0)),
                _kv_spec(),
                _kv_spec(),
            ],
            out_specs=pl.BlockSpec((pl.Squeezed(), TQ, Dp),
                                   lambda b, qi, ki: (b, qi, 0)),
            scratch_shapes=[
                pltpu.VMEM((TQ, 1), jnp.float32),    # m (running max)
                pltpu.VMEM((TQ, 1), jnp.float32),    # l (running denom)
                pltpu.VMEM((TQ, Dp), jnp.float32),   # acc
            ],
        ),
        compiler_params=pltpu.CompilerParams(
            dimension_semantics=("parallel", "parallel", "arbitrary"),
            vmem_limit_bytes=_vmem_limit(attn_ws),
        ),
    )(q, k, v)

    return out_pad[:, :S, :D]


def _reference(x, wq, bq, wk, bk, wv, bv):
    q = x @ wq.T + bq
    k = x @ wk.T + bk
    v = x @ wv.T + bv
    scores = jnp.einsum("bqd,bkd->bqk", q, k) / math.sqrt(x.shape[-1])
    w = jax.nn.softmax(scores, axis=-1)
    return jnp.einsum("bqk,bkd->bqd", w, v)


def _make_params(key, D):
    # Deterministic nn.Linear-like init (uniform in +-1/sqrt(dim)).
    lim = 1.0 / math.sqrt(D)
    ks = jax.random.split(key, 6)
    wq = jax.random.uniform(ks[0], (D, D), jnp.float32, -lim, lim)
    wk = jax.random.uniform(ks[1], (D, D), jnp.float32, -lim, lim)
    wv = jax.random.uniform(ks[2], (D, D), jnp.float32, -lim, lim)
    bq = jax.random.uniform(ks[3], (D,), jnp.float32, -lim, lim)
    bk = jax.random.uniform(ks[4], (D,), jnp.float32, -lim, lim)
    bv = jax.random.uniform(ks[5], (D,), jnp.float32, -lim, lim)
    return wq, bq, wk, bk, wv, bv


if __name__ == "__main__":
    key = jax.random.PRNGKey(0)
    kp, kx1, kx2 = jax.random.split(key, 3)

    # Small case from the module spec: (batch=2, seq=8, dim=32).
    B, S, D = 2, 8, 32
    params = _make_params(kp, D)
    x = jax.random.normal(kx1, (B, S, D), dtype=jnp.float32)
    out = jax.block_until_ready(causal_attention(x, *params))
    ref = _reference(x, *params)
    assert out.shape == (B, S, D)
    # bf16 MXU operands + approx reciprocal -> dtype-appropriate tolerance.
    assert jnp.allclose(out, ref, atol=3e-2, rtol=3e-2)

    # Medium case: exercises multi-tile grids, VMEM-resident K/V and the
    # gated padded-key masking path (S_pad != S).
    B2, S2 = 2, 300
    x2 = jax.random.normal(kx2, (B2, S2, D), dtype=jnp.float32)
    out2 = jax.block_until_ready(causal_attention(x2, *params))
    ref2 = _reference(x2, *params)
    assert out2.shape == (B2, S2, D)
    assert jnp.allclose(out2, ref2, atol=4e-2, rtol=4e-2)

    print("KERNEL_OK")
</pallas_src>

<mosaic_0001>
module attributes {stable_mosaic.version = 11 : i64} {
  func.func @qkv_proj_kernel(%arg0: i32, %arg1: memref<16x128xbf16, #tpu.memory_space<vmem>>, %arg2: memref<128x384xbf16, #tpu.memory_space<vmem>>, %arg3: memref<1x384xf32, #tpu.memory_space<vmem>>, %arg4: memref<16x128xbf16, #tpu.memory_space<vmem>>, %arg5: memref<16x128xbf16, #tpu.memory_space<vmem>>, %arg6: memref<16x128xbf16, #tpu.memory_space<vmem>>) attributes {dimension_semantics = [#tpu.dimension_semantics<parallel>], iteration_bounds = array<i64: 1>, scalar_prefetch = 0 : i64, scratch_operands = 0 : i64, tpu.core_type = #tpu.core_type<tc>, window_params = [{transform_indices = @transform_0, window_bounds = array<i64: 16, 128>}, {pipeline_mode = #tpu.pipeline_mode<synchronous>, transform_indices = @transform_1, window_bounds = array<i64: 128, 384>}, {pipeline_mode = #tpu.pipeline_mode<synchronous>, transform_indices = @transform_2, window_bounds = array<i64: 1, 384>}, {transform_indices = @transform_3, window_bounds = array<i64: 16, 128>}, {transform_indices = @transform_4, window_bounds = array<i64: 16, 128>}, {transform_indices = @transform_5, window_bounds = array<i64: 16, 128>}]} {
    %c0 = arith.constant 0 : index
    %c0_0 = arith.constant 0 : index
    %0 = vector.load %arg1[%c0, %c0_0] : memref<16x128xbf16, #tpu.memory_space<vmem>>, vector<16x128xbf16>
    %c0_1 = arith.constant 0 : index
    %c0_2 = arith.constant 0 : index
    %1 = vector.load %arg2[%c0_1, %c0_2] : memref<128x384xbf16, #tpu.memory_space<vmem>>, vector<128x384xbf16>
    %cst = arith.constant dense<0.000000e+00> : vector<16x384xf32>
    %2 = tpu.matmul %0, %1, %cst {dimension_numbers = #tpu.dot_dimension_numbers<[1], [0], [0], [1], [0, 0, 1, 1], [], []>} : vector<16x128xbf16>, vector<128x384xbf16>, vector<16x384xf32> -> vector<16x384xf32>
    %c0_3 = arith.constant 0 : index
    %c0_4 = arith.constant 0 : index
    %3 = vector.load %arg3[%c0_3, %c0_4] : memref<1x384xf32, #tpu.memory_space<vmem>>, vector<1x384xf32>
    %4 = vector.broadcast %3 : vector<1x384xf32> to vector<16x384xf32>
    %5 = arith.addf %2, %4 : vector<16x384xf32>
    %6 = vector.extract_strided_slice %5 {offsets = [0, 0], sizes = [16, 128], strides = [1, 1]} : vector<16x384xf32> to vector<16x128xf32>
    %7 = arith.truncf %6 : vector<16x128xf32> to vector<16x128xbf16>
    %c0_5 = arith.constant 0 : index
    %c0_6 = arith.constant 0 : index
    %8 = vector.load %arg4[%c0_5, %c0_6] : memref<16x128xbf16, #tpu.memory_space<vmem>>, vector<16x128xbf16>
    tpu.vector_store %arg4[%c0_5, %c0_6], %7 {strides = array<i32>} : memref<16x128xbf16, #tpu.memory_space<vmem>>, vector<16x128xbf16>,
    %9 = vector.extract_strided_slice %5 {offsets = [0, 128], sizes = [16, 128], strides = [1, 1]} : vector<16x384xf32> to vector<16x128xf32>
    %10 = arith.truncf %9 : vector<16x128xf32> to vector<16x128xbf16>
    %c0_7 = arith.constant 0 : index
    %c0_8 = arith.constant 0 : index
    %11 = vector.load %arg5[%c0_7, %c0_8] : memref<16x128xbf16, #tpu.memory_space<vmem>>, vector<16x128xbf16>
    tpu.vector_store %arg5[%c0_7, %c0_8], %10 {strides = array<i32>} : memref<16x128xbf16, #tpu.memory_space<vmem>>, vector<16x128xbf16>,
    %12 = vector.extract_strided_slice %5 {offsets = [0, 256], sizes = [16, 128], strides = [1, 1]} : vector<16x384xf32> to vector<16x128xf32>
    %13 = arith.truncf %12 : vector<16x128xf32> to vector<16x128xbf16>
    %c0_9 = arith.constant 0 : index
    %c0_10 = arith.constant 0 : index
    %14 = vector.load %arg6[%c0_9, %c0_10] : memref<16x128xbf16, #tpu.memory_space<vmem>>, vector<16x128xbf16>
    tpu.vector_store %arg6[%c0_9, %c0_10], %13 {strides = array<i32>} : memref<16x128xbf16, #tpu.memory_space<vmem>>, vector<16x128xbf16>,
    return
  }
  func.func @transform_0(%arg0: i32) -> (i32, i32) {
    %c0_i32 = arith.constant 0 : i32
    %c0_i32_0 = arith.constant 0 : i32
    return %arg0, %c0_i32 : i32, i32
  }
  func.func @transform_1(%arg0: i32) -> (i32, i32) {
    %c0_i32 = arith.constant 0 : i32
    %c0_i32_0 = arith.constant 0 : i32
    %c0_i32_1 = arith.constant 0 : i32
    return %c0_i32, %c0_i32_0 : i32, i32
  }
  func.func @transform_2(%arg0: i32) -> (i32, i32) {
    %c0_i32 = arith.constant 0 : i32
    %c0_i32_0 = arith.constant 0 : i32
    %c0_i32_1 = arith.constant 0 : i32
    return %c0_i32, %c0_i32_0 : i32, i32
  }
  func.func @transform_3(%arg0: i32) -> (i32, i32) {
    %c0_i32 = arith.constant 0 : i32
    %c0_i32_0 = arith.constant 0 : i32
    return %arg0, %c0_i32 : i32, i32
  }
  func.func @transform_4(%arg0: i32) -> (i32, i32) {
    %c0_i32 = arith.constant 0 : i32
    %c0_i32_0 = arith.constant 0 : i32
    return %arg0, %c0_i32 : i32, i32
  }
  func.func @transform_5(%arg0: i32) -> (i32, i32) {
    %c0_i32 = arith.constant 0 : i32
    %c0_i32_0 = arith.constant 0 : i32
    return %arg0, %c0_i32 : i32, i32
  }
}

</mosaic_0001>

<bundles_post_ra>
// kernel: tpu_custom_call.1
= control target key start
LH: loop header
LB: loop body
LE: loop exit
PB: predicated region body
PF: predicated region fallthrough
CT: control target
= control target key end

     0   :  { %11 = vsyncpa [#allocation3], 0  ;;  %s771_s0 = inlined_call_operand.hbm [shape: bf16[16,128], index: 0, kind: input, shape index: {}]   ;;  %s772_s1 = inlined_call_operand.hbm [shape: bf16[128,384], index: 1, kind: input, shape index: {}]   ;;  %s773_s2 = inlined_call_operand.vmem [shape: f32[1,384], index: 2, kind: input, shape index: {}]   ;;  %s774_s3 = inlined_call_operand.hbm [shape: bf16[16,128], index: 3, kind: output, shape index: {0}]   ;;  %s775_s4 = inlined_call_operand.hbm [shape: bf16[16,128], index: 4, kind: output, shape index: {1}]   ;;  %s776_s5 = inlined_call_operand.hbm [shape: bf16[16,128], index: 5, kind: output, shape index: {2}]  }
   0x1   :  { %12 = vsyncpa [#allocation6], 0 }
   0x2   :  { %13 = vsyncpa [#allocation4], 0 }
   0x3   :  { %14 = vsyncpa [#allocation9], 0  ;;  %s640_s18 = smov [#allocation2]   ;;  %s522_s22 = scalar_lea.hbm %s771_s0, 128 }
   0x4   :  { %s20_s19 = sshll.u32 %s640_s18, 4  ;;  %p523_p0 = scmp.ne.s32.totalorder %s771_s0, %s522_s22  ;;  %s21_s19 = int_to_ptr.vmem [resolvable:$true] %s20_s19 }
   0x5   :  { %p526_p1 = scmp.lt.u32.totalorder %s522_s22, %s771_s0 }
   0x7   :  { %p528_p2 = pnand %p526_p1, %p523_p0 }
   0x9   :  { %531 = shalt.err (!%p528_p2)
}
   0xa   :  { %s532_s27 = scalar_lea.vmem %s21_s19, 128  ;;  %p537_p4 = scmp.lt.s32.totalorder %s21_s19, %s21_s19 }
   0xb   :  { %p533_p3 = scmp.ne.s32.totalorder %s21_s19, %s532_s27  ;;  %p538_p5 = scmp.lt.s32.totalorder %s532_s27, %s532_s27 }
   0xd   :  { %p539_p6 = por %p538_p5, %p537_p4 }
   0xf   :  { %p540_p7 = pnand %p539_p6, %p533_p3 }
  0x11   :  { %543 = shalt.err (!%p540_p7)
}
  0x12   :  { %s641_s28 = smov 64   ;;  %s642_s29 = smov 4  }
  0x13   :  { %26 = dma.hbm_to_vmem [thread:$0]  %s771_s0, 128, %s21_s19, [#allocation3], %s641_s28, %s641_s28, %s642_s29  }
  0x14   :  { %s643_s7 = smov [#allocation5]   ;;  %s544_s11 = scalar_lea.hbm %s772_s1, 3072 }
  0x15   :  { %s32_s8 = sshll.u32 %s643_s7, 4  ;;  %p545_p8 = scmp.ne.s32.totalorder %s772_s1, %s544_s11  ;;  %s33_s8 = int_to_ptr.vmem [resolvable:$true] %s32_s8 }
  0x16   :  { %p548_p9 = scmp.lt.u32.totalorder %s544_s11, %s772_s1 }
  0x18   :  { %p550_p10 = pnand %p548_p9, %p545_p8 }
  0x1a   :  { %553 = shalt.err (!%p550_p10)
}
  0x1b   :  { %s554_s16 = scalar_lea.vmem %s33_s8, 3072  ;;  %p559_p12 = scmp.lt.s32.totalorder %s33_s8, %s33_s8 }
  0x1c   :  { %p555_p11 = scmp.ne.s32.totalorder %s33_s8, %s554_s16  ;;  %p560_p13 = scmp.lt.s32.totalorder %s554_s16, %s554_s16 }
  0x1e   :  { %p561_p0 = por %p560_p13, %p559_p12 }
  0x20   :  { %p562_p1 = pnand %p561_p0, %p555_p11 }
  0x22   :  { %565 = shalt.err (!%p562_p1)
}
  0x23   :  { %s644_s0 = smov 192   ;;  %s645_s17 = smov 12  }
  0x24   :  { %38 = dma.hbm_to_vmem [thread:$0]  %s772_s1, 3072, %s33_s8, [#allocation6], %s644_s0, %s644_s0, %s645_s17  }
  0x25   :  { %632 = dma.done.wait [#allocation3], 128  }
  0x26   :  { %633 = vsyncadd [#allocation3], 4294967168 }
  0x27   :  { %634 = dma.done.wait [#allocation6], 3072  }
  0x28   :  { %635 = vsyncadd [#allocation6], 4294964224  ;;  %v646_v0 = vmov 0.0   ;;  %vm647_vm0 = vmmov 0   ;;  %v648_v1 = vmov 0   ;;  %v521_v26 = vld [vmem:[#allocation2] sm:$0xff]   ;;  %v84_v27 = vlaneseq }
  0x29   :  { %457 = vmatprep.subr.bf16.mxu1 %v646_v0  ;;  %473 = vmatprep.mubr.msk.bf16.mxu1 %vm647_vm0, %v646_v0  ;;  %v489_v2 = vld [vmem:[#allocation5 + $0x4] ss:$12 sps:$4 sm:$0xff]   ;;  %v491_v3 = vld [vmem:[#allocation5 + $0x8] ss:$12 sps:$4 sm:$0xff]   ;;  %v492_v4 = vld [vmem:[#allocation5] ss:$12 sps:$4 sm:$0xff]  }
  0x2a   :  { %265 = vmatprep.mubr.bf16.mxu0 %v648_v1  ;;  %233 = vmatprep.subr.bf16.mxu0 %v489_v2  ;;  %v493_v5 = vld [vmem:[#allocation5 + $0x1c] ss:$12 sps:$4 sm:$0xff]   ;;  %v495_v6 = vld [vmem:[#allocation5 + $0x20] ss:$12 sps:$4 sm:$0xff]   ;;  %v496_v7 = vld [vmem:[#allocation5 + $0x18] ss:$12 sps:$4 sm:$0xff]  }
  0x2b   :  { %458 = vmatpush3.bf16.msra.mxu1 %v491_v3  ;;  %234 = vmatpush1.bf16.msra.mxu0 %v492_v4  ;;  %v497_v8 = vld [vmem:[#allocation5 + $0x34] ss:$12 sps:$4 sm:$0xff]   ;;  %v499_v9 = vld [vmem:[#allocation5 + $0x38] ss:$12 sps:$4 sm:$0xff]   ;;  %v500_v10 = vld [vmem:[#allocation5 + $0x30] ss:$12 sps:$4 sm:$0xff]  }
  0x2c   :  { %459 = vmatprep.subr.bf16.mxu1 %v646_v0  ;;  %235 = vmatprep.subr.bf16.mxu0 %v493_v5  ;;  %v501_v11 = vld [vmem:[#allocation5 + $0x4c] ss:$12 sps:$4 sm:$0xff]   ;;  %v503_v12 = vld [vmem:[#allocation5 + $0x50] ss:$12 sps:$4 sm:$0xff]   ;;  %v504_v13 = vld [vmem:[#allocation5 + $0x48] ss:$12 sps:$4 sm:$0xff]  }
  0x2d   :  { %v505_v14 = vld [vmem:[#allocation5 + $0x64] ss:$12 sps:$4 sm:$0xff]   ;;  %v507_v15 = vld [vmem:[#allocation5 + $0x68] ss:$12 sps:$4 sm:$0xff]   ;;  %v508_v16 = vld [vmem:[#allocation5 + $0x60] ss:$12 sps:$4 sm:$0xff]  }
  0x2e   :  { %v509_v17 = vld [vmem:[#allocation5 + $0x7c] ss:$12 sps:$4 sm:$0xff]   ;;  %v511_v18 = vld [vmem:[#allocation5 + $0x80] ss:$12 sps:$4 sm:$0xff]   ;;  %v512_v19 = vld [vmem:[#allocation5 + $0x78] ss:$12 sps:$4 sm:$0xff]  }
  0x2f   :  { %460 = vmatpush3.bf16.msra.mxu1 %v495_v6  ;;  %236 = vmatpush1.bf16.msra.mxu0 %v496_v7  ;;  %v513_v20 = vld [vmem:[#allocation5 + $0x94] ss:$12 sps:$4 sm:$0xff]   ;;  %v515_v21 = vld [vmem:[#allocation5 + $0x98] ss:$12 sps:$4 sm:$0xff]   ;;  %v516_v22 = vld [vmem:[#allocation5 + $0x90] ss:$12 sps:$4 sm:$0xff]  }
  0x30   :  { %461 = vmatprep.subr.bf16.mxu1 %v646_v0  ;;  %237 = vmatprep.subr.bf16.mxu0 %v497_v8  ;;  %v517_v23 = vld [vmem:[#allocation5 + $0xac] ss:$12 sps:$4 sm:$0xff]   ;;  %v519_v24 = vld [vmem:[#allocation5 + $0xb0] ss:$12 sps:$4 sm:$0xff]   ;;  %v520_v25 = vld [vmem:[#allocation5 + $0xa8] ss:$12 sps:$4 sm:$0xff]  }
  0x31   :  { %v85_v28 = vshrl.u32 %v84_v27, 7  ;;  %v82_v30 = vld [vmem:[%s773_s2] sm:$0x7]  ;;  %s649_s21 = smov [#allocation7]   ;;  %s650_s2 = smov [#allocation8]  }
  0x32   :  { %s352_s22 = sshll.u32 %s649_s21, 4  ;;  %s364_s23 = sshll.u32 %s650_s2, 4  ;;  %s353_s22 = int_to_ptr.vmem [resolvable:$true] %s352_s22  ;;  %s712_s23 = int_to_ptr.vmem [resolvable:$true] %s364_s23 }
  0x33   :  { %462 = vmatpush3.bf16.msra.mxu1 %v499_v9  ;;  %238 = vmatpush1.bf16.msra.mxu0 %v500_v10  ;;  %v94_v29 = vsub.s32 2, %v85_v28  ;;  %v86_v31 = vsub.s32 0, %v85_v28  ;;  %v90_v33 = vsub.s32 1, %v85_v28  ;;  %s651_s24 = smov [#allocation10]   ;;  %s566_s26 = scalar_lea.vmem %s353_s22, 128 }
  0x34   :  { %463 = vmatprep.subr.bf16.mxu1 %v646_v0  ;;  %239 = vmatprep.subr.bf16.mxu0 %v501_v11  ;;  %s376_s25 = sshll.u32 %s651_s24, 4  ;;  %p567_p2 = scmp.ne.s32.totalorder %s353_s22, %s566_s26  ;;  %s714_s25 = int_to_ptr.vmem [resolvable:$true] %s376_s25 }
  0x35   :  { %v95_v32 = vrot.slane %v82_v30, %v94_v29  ;;  %v87_v35 = vrot.slane %v82_v30, %v86_v31  ;;  %v91_v39 = vrot.slane %v82_v30, %v90_v33  ;;  %p571_p3 = scmp.lt.s32.totalorder %s353_s22, %s353_s22  ;;  %p572_p4 = scmp.lt.s32.totalorder %s566_s26, %s566_s26 }
  0x37   :  { %464 = vmatpush3.bf16.msra.mxu1 %v503_v12  ;;  %240 = vmatpush1.bf16.msra.mxu0 %v504_v13  ;;  %p573_p5 = por %p572_p4, %p571_p3 }
  0x38   :  { %465 = vmatprep.subr.bf16.mxu1 %v646_v0  ;;  %241 = vmatprep.subr.bf16.mxu0 %v505_v14 }
  0x39   :  { %p574_p6 = pnand %p573_p5, %p567_p2 }
  0x3b   :  { %466 = vmatpush3.bf16.msra.mxu1 %v507_v15  ;;  %242 = vmatpush1.bf16.msra.mxu0 %v508_v16 }
  0x3c   :  { %467 = vmatprep.subr.bf16.mxu1 %v646_v0  ;;  %243 = vmatprep.subr.bf16.mxu0 %v509_v17 }
  0x3f   :  { %468 = vmatpush3.bf16.msra.mxu1 %v511_v18  ;;  %244 = vmatpush1.bf16.msra.mxu0 %v512_v19 }
  0x40   :  { %469 = vmatprep.subr.bf16.mxu1 %v646_v0  ;;  %245 = vmatprep.subr.bf16.mxu0 %v513_v20 }
  0x43   :  { %470 = vmatpush3.bf16.msra.mxu1 %v515_v21  ;;  %246 = vmatpush1.bf16.msra.mxu0 %v516_v22 }
  0x44   :  { %471 = vmatprep.subr.bf16.mxu1 %v646_v0  ;;  %247 = vmatprep.subr.bf16.mxu0 %v517_v23 }
  0x47   :  { %472 = vmatpush3.bf16.msra.mxu1 %v519_v24  ;;  %248 = vmatpush1.bf16.msra.mxu0 %v520_v25 }
  0x4a   :  { %474 = vmatmul.mubr.bf16.vlgmr.msra.gmra.mrb[0].mxu1 %v521_v26  ;;  %266 = vmatmul.mubr.bf16.vlgmr.msra.gmra.mrb[0].mxu0 %v521_v26 }
 0x11d   :  { %v310_v34 = vpop.f32.mrb[0].mxu1  ;;  %v267_v37 = vpop.f32.mrb[0].mxu0 }
 0x11e   :  { %v311_v36 = vadd.f32 %v310_v34, %v95_v32  ;;  %v475_v38 = vpop.f32.mrb[1].mxu1  ;;  %v269_v40 = vpop.f32.mrb[1].mxu0  ;;  %v268_v45 = vadd.f32 %v267_v37, %v87_v35 }
 0x11f   :  { %v313_v41 = vpop.f32.mrb[2].mxu1  ;;  %v271_v43 = vpop.f32.mrb[2].mxu0  ;;  %v270_v48 = vadd.f32 %v269_v40, %v91_v39 }
 0x120   :  { %v314_v42 = vadd.f32 %v313_v41, %v95_v32  ;;  %v476_v44 = vpop.f32.mrb[3].mxu1  ;;  %v272_v46 = vadd.f32 %v271_v43, %v87_v35  ;;  %v273_v47 = vpop.f32.mrb[3].mxu0 }
 0x121   :  { %v274_v50 = vadd.f32 %v273_v47, %v91_v39 }
 0x122   :  { %v446_v49 = vpack.c.bf16 %v314_v42, %v311_v36  ;;  %v436_v51 = vpack.c.bf16 %v272_v46, %v268_v45 }
 0x123   :  { %v441_v52 = vpack.c.bf16 %v274_v50, %v270_v48 }
 0x124   :  { %447 = vst [vmem:[#allocation10] sm:$0xff] %v446_v49   ;;  %437 = vst [vmem:[#allocation7] sm:$0xff] %v436_v51  }
 0x125   :  { %442 = vst [vmem:[#allocation8] sm:$0xff] %v441_v52  }
 0x126   :  { %577 = shalt.err (!%p574_p6)
}
 0x127   :  { %s578_s6 = scalar_lea.hbm %s774_s3, 128 }
 0x128   :  { %p579_p7 = scmp.ne.s32.totalorder %s774_s3, %s578_s6  ;;  %p582_p8 = scmp.lt.u32.totalorder %s578_s6, %s774_s3 }
 0x12a   :  { %p584_p9 = pnand %p582_p8, %p579_p7 }
 0x12c   :  { %587 = shalt.err (!%p584_p9)
}
 0x12d   :  { %358 = dma.vmem_to_hbm [thread:$0]  %s353_s22, 128, %s774_s3, [#allocation4], %s641_s28, %s641_s28, %s642_s29  }
 0x12e   :  { %s588_s13 = scalar_lea.vmem %s712_s23, 128  ;;  %p593_p11 = scmp.lt.s32.totalorder %s712_s23, %s712_s23 }
 0x12f   :  { %p589_p10 = scmp.ne.s32.totalorder %s712_s23, %s588_s13  ;;  %p594_p12 = scmp.lt.s32.totalorder %s588_s13, %s588_s13 }
 0x131   :  { %p595_p13 = por %p594_p12, %p593_p11 }
 0x133   :  { %p596_p0 = pnand %p595_p13, %p589_p10 }
 0x135   :  { %599 = shalt.err (!%p596_p0)
}
 0x136   :  { %s600_s16 = scalar_lea.hbm %s775_s4, 128 }
 0x137   :  { %p601_p1 = scmp.ne.s32.totalorder %s775_s4, %s600_s16  ;;  %p604_p2 = scmp.lt.u32.totalorder %s600_s16, %s775_s4 }
 0x139   :  { %p606_p3 = pnand %p604_p2, %p601_p1 }
 0x13b   :  { %609 = shalt.err (!%p606_p3)
}
 0x13c   :  { %370 = dma.vmem_to_hbm [thread:$0]  %s712_s23, 128, %s775_s4, [#allocation9], %s641_s28, %s641_s28, %s642_s29  }
 0x13d   :  { %s610_s20 = scalar_lea.vmem %s714_s25, 128  ;;  %p615_p5 = scmp.lt.s32.totalorder %s714_s25, %s714_s25 }
 0x13e   :  { %p611_p4 = scmp.ne.s32.totalorder %s714_s25, %s610_s20  ;;  %p616_p6 = scmp.lt.s32.totalorder %s610_s20, %s610_s20 }
 0x140   :  { %p617_p7 = por %p616_p6, %p615_p5 }
 0x142   :  { %p618_p8 = pnand %p617_p7, %p611_p4 }
 0x144   :  { %621 = shalt.err (!%p618_p8)
}
 0x145   :  { %s622_s2 = scalar_lea.hbm %s776_s5, 128 }
 0x146   :  { %p623_p9 = scmp.ne.s32.totalorder %s776_s5, %s622_s2  ;;  %p626_p10 = scmp.lt.u32.totalorder %s622_s2, %s776_s5 }
 0x148   :  { %p628_p11 = pnand %p626_p10, %p623_p9 }
 0x14a   :  { %631 = shalt.err (!%p628_p11)
}
 0x14b   :  { %382 = dma.vmem_to_hbm [thread:$0]  %s714_s25, 128, %s776_s5, [#allocation9], %s641_s28, %s641_s28, %s642_s29  }
 0x14c   :  { %636 = dma.done.wait [#allocation4], 128  }
 0x14d   :  { %637 = vsyncadd [#allocation4], 4294967168 }
 0x14e   :  { %638 = dma.done.wait [#allocation9], 256  }
 0x14f   :  { %639 = vsyncadd [#allocation9], 4294967040 }
 0x150   :  { %392 = vsyncpa [#allocation3], 1 }
 0x151   :  { %393 = vsyncpa [#allocation6], 1 }
 0x152   :  { %394 = vsyncpa [#allocation4], 1 }
 0x153   :  { %395 = vsyncpa [#allocation9], 1 }

</bundles_post_ra>
